<compile_context>
chip_gen: v6e
topology: v6e:2x2x1
jax: 0.10.0
libtpu: 0.0.40
codegen_flags: <defaults>
</compile_context>

<pallas_src>
import functools

import jax
import jax.numpy as jnp
from jax.experimental import pallas as pl
from jax.experimental.pallas import tpu as pltpu


def _soft_ce_kernel(x_ref, t_ref, lbl_ref, out_ref, kl_acc, ce_acc, *, alpha, n_total):
    i = pl.program_id(0)

    @pl.when(i == 0)
    def _():
        kl_acc[...] = jnp.zeros_like(kl_acc)
        ce_acc[...] = jnp.zeros_like(ce_acc)

    x = x_ref[...].astype(jnp.float32)   # (TN, C) student logits
    t = t_ref[...].astype(jnp.float32)   # (TN, C) teacher logits
    labels = lbl_ref[...]                # (TN, 1) int32 true labels (-1 on padded rows)
    tn, c = x.shape

    # log_softmax(input, dim=1), numerically stable
    x_max = jnp.max(x, axis=1, keepdims=True)
    x_shift = x - x_max
    lse_x = jnp.log(jnp.sum(jnp.exp(x_shift), axis=1, keepdims=True))
    logp = x_shift - lse_x

    # softmax(target, dim=1) and its log — one exp, one log(denom), both reused
    t_max = jnp.max(t, axis=1, keepdims=True)
    t_shift = t - t_max
    et = jnp.exp(t_shift)
    denom = jnp.sum(et, axis=1, keepdims=True)
    log_denom = jnp.log(denom)
    q = et / denom
    logq = t_shift - log_denom

    # KLDivLoss(size_average=False): sum over the tile of q * (log q - log p)
    row_kl = jnp.sum(q * (logq - logp), axis=1, keepdims=True)          # (TN, 1)

    # cross_entropy numerator: -log p at the label column, via iota compare
    # (no one-hot input stream; padded rows have label == -1 -> contribute 0)
    col = jax.lax.broadcasted_iota(jnp.int32, (tn, c), 1)
    mask = col == labels
    row_ce = -jnp.sum(jnp.where(mask, logp, 0.0), axis=1, keepdims=True)  # (TN, 1)

    # accumulate raw sums across grid steps (scaling is applied once, at the end)
    kl_acc[...] += jnp.sum(row_kl, axis=0, keepdims=True)
    ce_acc[...] += jnp.sum(row_ce, axis=0, keepdims=True)

    @pl.when(i == pl.num_programs(0) - 1)
    def _():
        out_ref[...] = alpha * kl_acc[...] + ((1.0 - alpha) / n_total) * ce_acc[...]


def _auto_block_rows(n, c, itemsize, vmem_limit_bytes):
    """Largest multiple-of-8 row tile that double-buffers under ~2/3 of the VMEM budget."""
    budget = (2 * vmem_limit_bytes) // 3
    # 2 logit streams x 2 pipeline buffers x C x bytes/elem (+ labels, f32 temps headroom)
    per_row = 2 * 2 * c * max(int(itemsize), 4) + 8
    tn = budget // max(per_row, 1)
    if tn >= n:
        return n
    return max(8, (min(int(tn), 2048) // 8) * 8)


def soft_cross_entropy(inputs, targets, true_labels, alpha=0.95,
                       block_rows=None, vmem_limit_bytes=48 * 1024 * 1024):
    """Pallas implementation of softCrossEntropy.forward. Returns a scalar f32."""
    n, c = inputs.shape
    labels = true_labels.astype(jnp.int32).reshape(n, 1)

    if block_rows is None:
        tn = _auto_block_rows(n, c, jnp.dtype(inputs.dtype).itemsize, vmem_limit_bytes)
    else:
        tn = int(block_rows)
    if tn >= n:
        tn = n                       # single tile: block == full array (no (8,128) issue)
    else:
        tn = max(8, (tn // 8) * 8)   # tiled: row-block must be a multiple of 8

    n_pad = int(pl.cdiv(n, tn)) * tn
    if n_pad != n:
        pad = n_pad - n
        # zero logits -> logq == logp (KL contribution 0); label -1 -> CE contribution 0
        inputs = jnp.pad(inputs, ((0, pad), (0, 0)))
        targets = jnp.pad(targets, ((0, pad), (0, 0)))
        labels = jnp.pad(labels, ((0, pad), (0, 0)), constant_values=-1)

    num_tiles = n_pad // tn
    kernel = functools.partial(_soft_ce_kernel, alpha=float(alpha), n_total=int(n))

    out = pl.pallas_call(
        kernel,
        out_shape=jax.ShapeDtypeStruct((1, 1), jnp.float32),
        grid_spec=pltpu.PrefetchScalarGridSpec(
            num_scalar_prefetch=0,
            grid=(num_tiles,),
            in_specs=[
                pl.BlockSpec((tn, c), lambda i: (i, 0)),   # student logits tile
                pl.BlockSpec((tn, c), lambda i: (i, 0)),   # teacher logits tile
                pl.BlockSpec((tn, 1), lambda i: (i, 0)),   # int32 labels column
            ],
            out_specs=pl.BlockSpec((1, 1), lambda i: (0, 0)),
            scratch_shapes=[
                pltpu.VMEM((1, 1), jnp.float32),   # KL accumulator
                pltpu.VMEM((1, 1), jnp.float32),   # CE accumulator
            ],
        ),
        compiler_params=pltpu.CompilerParams(
            dimension_semantics=("arbitrary",),          # reduction over batch tiles
            vmem_limit_bytes=int(vmem_limit_bytes),
        ),
    )(inputs, targets, labels)
    return out[0, 0]


def _reference(inputs, targets, true_labels, alpha=0.95):
    logp = jax.nn.log_softmax(inputs.astype(jnp.float32), axis=1)
    q = jax.nn.softmax(targets.astype(jnp.float32), axis=1)
    logq = jax.nn.log_softmax(targets.astype(jnp.float32), axis=1)
    kl = jnp.sum(q * (logq - logp))
    ce = jnp.mean(-jnp.take_along_axis(logp, true_labels[:, None], axis=1))
    return alpha * kl + (1 - alpha) * ce


if __name__ == "__main__":
    key = jax.random.PRNGKey(0)
    k1, k2, k3 = jax.random.split(key, 3)

    N, C = 16, 128  # small batch, lane-dense class axis
    inputs = jax.random.normal(k1, (N, C), dtype=jnp.float32)
    targets = jax.random.normal(k2, (N, C), dtype=jnp.float32)
    true_labels = jax.random.randint(k3, (N,), 0, C, dtype=jnp.int32)

    ref = _reference(inputs, targets, true_labels, alpha=0.95)

    # 1) auto-sized tile (single block for this toy shape)
    loss1 = jax.block_until_ready(
        soft_cross_entropy(inputs, targets, true_labels, alpha=0.95))
    assert jnp.allclose(loss1, ref, rtol=1e-5, atol=1e-5), (loss1, ref)

    # 2) multi-tile accumulation path (2 grid steps of 8 rows)
    loss2 = jax.block_until_ready(
        soft_cross_entropy(inputs, targets, true_labels, alpha=0.95, block_rows=8))
    assert jnp.allclose(loss2, ref, rtol=1e-5, atol=1e-5), (loss2, ref)

    # 3) ragged batch -> zero-padding path (12 rows, tiles of 8 -> padded to 16)
    N2 = 12
    in2, tg2, lb2 = inputs[:N2], targets[:N2], true_labels[:N2]
    ref2 = _reference(in2, tg2, lb2, alpha=0.95)
    loss3 = jax.block_until_ready(
        soft_cross_entropy(in2, tg2, lb2, alpha=0.95, block_rows=8))
    assert jnp.allclose(loss3, ref2, rtol=1e-5, atol=1e-5), (loss3, ref2)

    print("KERNEL_OK")
</pallas_src>

<mosaic_0001>
module attributes {stable_mosaic.version = 11 : i64} {
  func.func @_soft_ce_kernel(%arg0: i32, %arg1: memref<16x128xf32, #tpu.memory_space<vmem>>, %arg2: memref<16x128xf32, #tpu.memory_space<vmem>>, %arg3: memref<16x1xi32, #tpu.memory_space<vmem>>, %arg4: memref<1x1xf32, #tpu.memory_space<vmem>>, %arg5: memref<1x1xf32, #tpu.memory_space<vmem>>, %arg6: memref<1x1xf32, #tpu.memory_space<vmem>>) attributes {dimension_semantics = [#tpu.dimension_semantics<arbitrary>], iteration_bounds = array<i64: 1>, scalar_prefetch = 0 : i64, scratch_operands = 2 : i64, tpu.core_type = #tpu.core_type<tc>, window_params = [{transform_indices = @transform_0, window_bounds = array<i64: 16, 128>}, {transform_indices = @transform_1, window_bounds = array<i64: 16, 128>}, {transform_indices = @transform_2, window_bounds = array<i64: 16, 1>}, {pipeline_mode = #tpu.pipeline_mode<synchronous>, transform_indices = @transform_3, window_bounds = array<i64: 1, 1>}]} {
    %c0_i32 = arith.constant 0 : i32
    %0 = arith.cmpi eq, %arg0, %c0_i32 : i32
    %1 = arith.extui %0 : i1 to i32
    %c0_i32_0 = arith.constant 0 : i32
    %2 = arith.cmpi ne, %1, %c0_i32_0 : i32
    scf.if %2 {
      %cst_25 = arith.constant 0.000000e+00 : f32
      %54 = vector.broadcast %cst_25 : f32 to vector<1x1xf32>
      %c0_26 = arith.constant 0 : index
      %c0_27 = arith.constant 0 : index
      %55 = vector.load %arg5[%c0_26, %c0_27] : memref<1x1xf32, #tpu.memory_space<vmem>>, vector<1x1xf32>
      tpu.vector_store %arg5[%c0_26, %c0_27], %54 {strides = array<i32>} : memref<1x1xf32, #tpu.memory_space<vmem>>, vector<1x1xf32>,
      %cst_28 = arith.constant 0.000000e+00 : f32
      %56 = vector.broadcast %cst_28 : f32 to vector<1x1xf32>
      %c0_29 = arith.constant 0 : index
      %c0_30 = arith.constant 0 : index
      %57 = vector.load %arg6[%c0_29, %c0_30] : memref<1x1xf32, #tpu.memory_space<vmem>>, vector<1x1xf32>
      tpu.vector_store %arg6[%c0_29, %c0_30], %56 {strides = array<i32>} : memref<1x1xf32, #tpu.memory_space<vmem>>, vector<1x1xf32>,
    } else {
    }
    %c0 = arith.constant 0 : index
    %c0_1 = arith.constant 0 : index
    %3 = vector.load %arg1[%c0, %c0_1] : memref<16x128xf32, #tpu.memory_space<vmem>>, vector<16x128xf32>
    %c0_2 = arith.constant 0 : index
    %c0_3 = arith.constant 0 : index
    %4 = vector.load %arg2[%c0_2, %c0_3] : memref<16x128xf32, #tpu.memory_space<vmem>>, vector<16x128xf32>
    %c0_4 = arith.constant 0 : index
    %c0_5 = arith.constant 0 : index
    %5 = vector.load %arg3[%c0_4, %c0_5] : memref<16x1xi32, #tpu.memory_space<vmem>>, vector<16x1xi32>
    %cst = arith.constant dense<0xFF800000> : vector<16xf32>
    %6 = vector.multi_reduction <maximumf>, %3, %cst [1] : vector<16x128xf32> to vector<16xf32>
    %7 = vector.shape_cast %6 : vector<16xf32> to vector<16x1xf32>
    %8 = vector.broadcast %7 : vector<16x1xf32> to vector<16x128xf32>
    %9 = arith.subf %3, %8 : vector<16x128xf32>
    %10 = math.exp %9 : vector<16x128xf32>
    %cst_6 = arith.constant dense<0.000000e+00> : vector<16xf32>
    %11 = vector.multi_reduction <add>, %10, %cst_6 [1] : vector<16x128xf32> to vector<16xf32>
    %12 = vector.shape_cast %11 : vector<16xf32> to vector<16x1xf32>
    %13 = math.log %12 : vector<16x1xf32>
    %14 = vector.broadcast %13 : vector<16x1xf32> to vector<16x128xf32>
    %15 = arith.subf %9, %14 : vector<16x128xf32>
    %cst_7 = arith.constant dense<0xFF800000> : vector<16xf32>
    %16 = vector.multi_reduction <maximumf>, %4, %cst_7 [1] : vector<16x128xf32> to vector<16xf32>
    %17 = vector.shape_cast %16 : vector<16xf32> to vector<16x1xf32>
    %18 = vector.broadcast %17 : vector<16x1xf32> to vector<16x128xf32>
    %19 = arith.subf %4, %18 : vector<16x128xf32>
    %20 = math.exp %19 : vector<16x128xf32>
    %cst_8 = arith.constant dense<0.000000e+00> : vector<16xf32>
    %21 = vector.multi_reduction <add>, %20, %cst_8 [1] : vector<16x128xf32> to vector<16xf32>
    %22 = vector.shape_cast %21 : vector<16xf32> to vector<16x1xf32>
    %23 = math.log %22 : vector<16x1xf32>
    %24 = vector.broadcast %22 : vector<16x1xf32> to vector<16x128xf32>
    %25 = arith.divf %20, %24 : vector<16x128xf32>
    %26 = vector.broadcast %23 : vector<16x1xf32> to vector<16x128xf32>
    %27 = arith.subf %19, %26 : vector<16x128xf32>
    %28 = arith.subf %27, %15 : vector<16x128xf32>
    %29 = arith.mulf %25, %28 : vector<16x128xf32>
    %cst_9 = arith.constant dense<0.000000e+00> : vector<16xf32>
    %30 = vector.multi_reduction <add>, %29, %cst_9 [1] : vector<16x128xf32> to vector<16xf32>
    %31 = vector.shape_cast %30 : vector<16xf32> to vector<16x1xf32>
    %32 = tpu.iota {dimensions = array<i32: 1>} : vector<16x128xi32>
    %33 = vector.broadcast %5 : vector<16x1xi32> to vector<16x128xi32>
    %34 = arith.cmpi eq, %32, %33 : vector<16x128xi32>
    %cst_10 = arith.constant 0.000000e+00 : f32
    %35 = vector.broadcast %cst_10 : f32 to vector<16x128xf32>
    %36 = arith.select %34, %15, %35 : vector<16x128xi1>, vector<16x128xf32>
    %cst_11 = arith.constant dense<0.000000e+00> : vector<16xf32>
    %37 = vector.multi_reduction <add>, %36, %cst_11 [1] : vector<16x128xf32> to vector<16xf32>
    %38 = vector.shape_cast %37 : vector<16xf32> to vector<16x1xf32>
    %cst_12 = arith.constant 0.000000e+00 : f32
    %39 = vector.broadcast %cst_12 : f32 to vector<16x1xf32>
    %40 = arith.subf %39, %38 : vector<16x1xf32>
    %c0_13 = arith.constant 0 : index
    %c0_14 = arith.constant 0 : index
    %41 = vector.load %arg5[%c0_13, %c0_14] : memref<1x1xf32, #tpu.memory_space<vmem>>, vector<1x1xf32>
    %cst_15 = arith.constant dense<0.000000e+00> : vector<1xf32>
    %42 = vector.multi_reduction <add>, %31, %cst_15 [0] : vector<16x1xf32> to vector<1xf32>
    %43 = vector.shape_cast %42 : vector<1xf32> to vector<1x1xf32>
    %44 = arith.addf %41, %43 : vector<1x1xf32>
    %c0_16 = arith.constant 0 : index
    %c0_17 = arith.constant 0 : index
    %45 = vector.load %arg5[%c0_16, %c0_17] : memref<1x1xf32, #tpu.memory_space<vmem>>, vector<1x1xf32>
    tpu.vector_store %arg5[%c0_16, %c0_17], %44 {strides = array<i32>} : memref<1x1xf32, #tpu.memory_space<vmem>>, vector<1x1xf32>,
    %c0_18 = arith.constant 0 : index
    %c0_19 = arith.constant 0 : index
    %46 = vector.load %arg6[%c0_18, %c0_19] : memref<1x1xf32, #tpu.memory_space<vmem>>, vector<1x1xf32>
    %cst_20 = arith.constant dense<0.000000e+00> : vector<1xf32>
    %47 = vector.multi_reduction <add>, %40, %cst_20 [0] : vector<16x1xf32> to vector<1xf32>
    %48 = vector.shape_cast %47 : vector<1xf32> to vector<1x1xf32>
    %49 = arith.addf %46, %48 : vector<1x1xf32>
    %c0_21 = arith.constant 0 : index
    %c0_22 = arith.constant 0 : index
    %50 = vector.load %arg6[%c0_21, %c0_22] : memref<1x1xf32, #tpu.memory_space<vmem>>, vector<1x1xf32>
    tpu.vector_store %arg6[%c0_21, %c0_22], %49 {strides = array<i32>} : memref<1x1xf32, #tpu.memory_space<vmem>>, vector<1x1xf32>,
    %c0_i32_23 = arith.constant 0 : i32
    %51 = arith.cmpi eq, %arg0, %c0_i32_23 : i32
    %52 = arith.extui %51 : i1 to i32
    %c0_i32_24 = arith.constant 0 : i32
    %53 = arith.cmpi ne, %52, %c0_i32_24 : i32
    scf.if %53 {
      %c0_25 = arith.constant 0 : index
      %c0_26 = arith.constant 0 : index
      %54 = vector.load %arg5[%c0_25, %c0_26] : memref<1x1xf32, #tpu.memory_space<vmem>>, vector<1x1xf32>
      %cst_27 = arith.constant 0.949999988 : f32
      %55 = vector.broadcast %cst_27 : f32 to vector<1x1xf32>
      %56 = arith.mulf %55, %54 : vector<1x1xf32>
      %c0_28 = arith.constant 0 : index
      %c0_29 = arith.constant 0 : index
      %57 = vector.load %arg6[%c0_28, %c0_29] : memref<1x1xf32, #tpu.memory_space<vmem>>, vector<1x1xf32>
      %cst_30 = arith.constant 3.125000e-03 : f32
      %58 = vector.broadcast %cst_30 : f32 to vector<1x1xf32>
      %59 = arith.mulf %58, %57 : vector<1x1xf32>
      %60 = arith.addf %56, %59 : vector<1x1xf32>
      %c0_31 = arith.constant 0 : index
      %c0_32 = arith.constant 0 : index
      %61 = vector.load %arg4[%c0_31, %c0_32] : memref<1x1xf32, #tpu.memory_space<vmem>>, vector<1x1xf32>
      tpu.vector_store %arg4[%c0_31, %c0_32], %60 {strides = array<i32>} : memref<1x1xf32, #tpu.memory_space<vmem>>, vector<1x1xf32>,
    } else {
    }
    return
  }
  func.func @transform_0(%arg0: i32) -> (i32, i32) {
    %c0_i32 = arith.constant 0 : i32
    %c0_i32_0 = arith.constant 0 : i32
    return %arg0, %c0_i32 : i32, i32
  }
  func.func @transform_1(%arg0: i32) -> (i32, i32) {
    %c0_i32 = arith.constant 0 : i32
    %c0_i32_0 = arith.constant 0 : i32
    return %arg0, %c0_i32 : i32, i32
  }
  func.func @transform_2(%arg0: i32) -> (i32, i32) {
    %c0_i32 = arith.constant 0 : i32
    %c0_i32_0 = arith.constant 0 : i32
    return %arg0, %c0_i32 : i32, i32
  }
  func.func @transform_3(%arg0: i32) -> (i32, i32) {
    %c0_i32 = arith.constant 0 : i32
    %c0_i32_0 = arith.constant 0 : i32
    %c0_i32_1 = arith.constant 0 : i32
    return %c0_i32, %c0_i32_0 : i32, i32
  }
}

</mosaic_0001>

<bundles_post_ra>
// kernel: tpu_custom_call.1
= control target key start
LH: loop header
LB: loop body
LE: loop exit
PB: predicated region body
PF: predicated region fallthrough
CT: control target
= control target key end

     0   :  { %8 = vsyncpa [#allocation5], 0  ;;  %s278_s0 = inlined_call_operand.vmem [shape: f32[16,128], index: 0, kind: input, shape index: {}]   ;;  %s279_s1 = inlined_call_operand.hbm [shape: f32[16,128], index: 1, kind: input, shape index: {}]   ;;  %s280_s2 = inlined_call_operand.vmem [shape: s32[16,1], index: 2, kind: input, shape index: {}]   ;;  %s281_s3 = inlined_call_operand.hbm [shape: f32[1,1], index: 3, kind: output, shape index: {}]  }
   0x1   :  { %9 = vsyncpa [#allocation6], 0  ;;  %s229_s12 = smov [#allocation4]  }
   0x2   :  { %s17_s13 = sshll.u32 %s229_s12, 4  ;;  %s18_s13 = int_to_ptr.vmem [resolvable:$true] %s17_s13 }
   0x3   :  { %s193_s14 = scalar_lea.vmem %s18_s13, 256  ;;  %p198_p1 = scmp.lt.s32.totalorder %s18_s13, %s18_s13 }
   0x4   :  { %p194_p0 = scmp.ne.s32.totalorder %s18_s13, %s193_s14  ;;  %p199_p2 = scmp.lt.s32.totalorder %s193_s14, %s193_s14 }
   0x6   :  { %p200_p3 = por %p199_p2, %p198_p1 }
   0x8   :  { %p201_p4 = pnand %p200_p3, %p194_p0 }
   0xa   :  { %204 = shalt.err (!%p201_p4)
}
   0xb   :  { %s230_s15 = smov 128   ;;  %s231_s16 = smov 8  }
   0xc   :  { %23 = dma.hbm_to_vmem [thread:$0]  %s279_s1, 256, %s18_s13, [#allocation5], %s230_s15, %s230_s15, %s231_s16  }
   0xd   :  { %225 = dma.done.wait [#allocation5], 256  }
   0xe   :  { %226 = vsyncadd [#allocation5], 4294967040  ;;  %v36_v0 = vld [vmem:[%s278_s0] sm:$0xff]  ;;  %v37_v2 = vld [vmem:[%s278_s0 + $0x8] sm:$0xff]  ;;  %v232_v4 = vmov 0   ;;  %v94_v27 = vlaneseq  ;;  %vm33_vm2 = vcmask 0  }
   0xf   :  { %v38_v1 = vld [vmem:[#allocation4] sm:$0xff]  ;;  %42 = vmax.xlane.f32.xlu0 %v36_v0  ;;  %v39_v3 = vld [vmem:[#allocation4 + $0x8] sm:$0xff]  ;;  %164 = vset.pattern.permute.xlu1 %v232_v4  ;;  %v233_v53 = vmov 0.0  }
  0x10   :  { %62 = vmax.xlane.f32.xlu1 %v38_v1  ;;  %163 = vset.pattern.permute.xlu0 %v232_v4  ;;  %v41_v21 = vld [vmem:[%s280_s2 + $0x8] sm:$0xff]  ;;  %v40_v22 = vld [vmem:[%s280_s2] sm:$0xff]  ;;  %v95_v28 = vand.u32 127, %v94_v27  ;;  %34 = vst.msk [vmem:[#allocation2] sm:$0x1] %vm33_vm2, %v233_v53  ;;  %s234_s2 = smov [#allocation7]  }
  0x11   :  { %35 = vst.msk [vmem:[#allocation3] sm:$0x1] %vm33_vm2, %v233_v53  ;;  %s148_s25 = sshll.u32 %s234_s2, 4  ;;  %s149_s25 = int_to_ptr.vmem [resolvable:$true] %s148_s25 }
  0x12   :  { %s205_s26 = scalar_lea.vmem %s149_s25, 16  ;;  %s209_s27 = scalar_lea.vmem %s149_s25, 32 }
  0x13   :  { %44 = vmax.xlane.f32.xlu0 %v37_v2  ;;  %p206_p5 = scmp.ne.s32.totalorder %s149_s25, %s205_s26  ;;  %p210_p6 = scmp.lt.s32.totalorder %s149_s25, %s149_s25 }
  0x14   :  { %64 = vmax.xlane.f32.xlu1 %v39_v3  ;;  %p211_p7 = scmp.lt.s32.totalorder %s209_s27, %s205_s26 }
  0x16   :  { %p212_p8 = por %p211_p7, %p210_p6 }
  0x18   :  { %p213_p9 = pnand %p212_p8, %p206_p5 }
  0x98   :  { %v43_v5 = vpop.xlane.xlu0 %42 }
  0x99   :  { %v63_v6 = vpop.xlane.xlu1 %62  ;;  %v46_v7 = vsub.f32 %v36_v0, %v43_v5  ;;  %v123_v5 = vld [vmem:[#allocation3] sm:$0x1] }
  0x9a   :  { %v66_v8 = vsub.f32 %v38_v1, %v63_v6 }
  0x9b   :  { %v48_v9 = vmul.f32 1.442695, %v46_v7 }
  0x9c   :  { %v68_v10 = vmul.f32 1.442695, %v66_v8  ;;  %v45_v11 = vpop.xlane.xlu0 %44 }
  0x9d   :  { %v65_v12 = vpop.xlane.xlu1 %64  ;;  %165 = vpow2.f32 %v48_v9  ;;  %v47_v13 = vsub.f32 %v37_v2, %v45_v11  ;;  %v112_v11 = vld [vmem:[#allocation2] sm:$0x1] }
  0x9e   :  { %v67_v14 = vsub.f32 %v39_v3, %v65_v12  ;;  %167 = vpow2.f32 %v68_v10 }
  0x9f   :  { %v50_v15 = vmul.f32 1.442695, %v47_v13 }
  0xa0   :  { %v70_v16 = vmul.f32 1.442695, %v67_v14 }
  0xa1   :  { %169 = vpow2.f32 %v50_v15 }
  0xa2   :  { %171 = vpow2.f32 %v70_v16 }
  0xaa   :  { %v166_v17 = vpop.eup %165 }
  0xab   :  { %52 = vadd.xlane.f32.xlu0 %v166_v17  ;;  %v168_v18 = vpop.eup %167 }
  0xae   :  { %v170_v19 = vpop.eup %169 }
  0xaf   :  { %72 = vadd.xlane.f32.xlu0 %v168_v18  ;;  %54 = vadd.xlane.f32.xlu1 %v170_v19  ;;  %v172_v20 = vpop.eup %171 }
  0xb3   :  { %74 = vadd.xlane.f32.xlu1 %v172_v20 }
  0xc4   :  { %100 = vperm.xlu1 %164, %v41_v21  }
  0xc5   :  { %97 = vperm.xlu0 %163, %v40_v22  }
 0x134   :  { %v53_v23 = vpop.xlane.xlu0 %52 }
 0x135   :  { %173 = vlog2.f32 %v53_v23 }
 0x138   :  { %v55_v24 = vpop.xlane.xlu1 %54  ;;  %v73_v25 = vpop.xlane.xlu0 %72 }
 0x139   :  { %175 = vlog2.f32 %v55_v24 }
 0x13a   :  { %177 = vlog2.f32 %v73_v25 }
 0x13b   :  { %179 = vrcp.f32 %v73_v25 }
 0x13c   :  { %v75_v26 = vpop.xlane.xlu1 %74 }
 0x13d   :  { %181 = vlog2.f32 %v75_v26 }
 0x13e   :  { %183 = vrcp.f32 %v75_v26 }
 0x140   :  { %v98_v29 = vpop.permute.xlu0 %97  ;;  %v101_v33 = vpop.permute.xlu1 %100 }
 0x141   :  { %vm102_vm0 = vcmp.eq.s32.totalorder %v95_v28, %v98_v29  ;;  %vm103_vm1 = vcmp.eq.s32.totalorder %v95_v28, %v101_v33 }
 0x142   :  { %v174_v30 = vpop.eup %173 }
 0x143   :  { %v57_v31 = vmul.f32 0.6931472, %v174_v30 }
 0x145   :  { %v60_v32 = vsub.f32 %v46_v7, %v57_v31 }
 0x146   :  { %v176_v34 = vpop.eup %175 }
 0x147   :  { %v178_v35 = vpop.eup %177  ;;  %v59_v36 = vmul.f32 0.6931472, %v176_v34  ;;  %v104_v37 = vsel %vm102_vm0, %v60_v32, 0.0 }
 0x148   :  { %v77_v38 = vmul.f32 0.6931472, %v178_v35  ;;  %106 = vadd.xlane.f32.xlu1 %v104_v37  ;;  %v180_v39 = vpop.eup %179 }
 0x149   :  { %v61_v40 = vsub.f32 %v47_v13, %v59_v36  ;;  %v81_v46 = vmul.f32 %v180_v39, %v168_v18 }
 0x14a   :  { %v182_v41 = vpop.eup %181  ;;  %v84_v42 = vsub.f32 %v66_v8, %v77_v38 }
 0x14b   :  { %v79_v43 = vmul.f32 0.6931472, %v182_v41  ;;  %v105_v44 = vsel %vm103_vm1, %v61_v40, 0.0  ;;  %v184_v45 = vpop.eup %183 }
 0x14c   :  { %108 = vadd.xlane.f32.xlu0 %v105_v44  ;;  %v86_v47 = vsub.f32 %v84_v42, %v60_v32  ;;  %v83_v50 = vmul.f32 %v184_v45, %v172_v20 }
 0x14d   :  { %v85_v48 = vsub.f32 %v67_v14, %v79_v43 }
 0x14e   :  { %v88_v49 = vmul.f32 %v86_v47, %v81_v46 }
 0x14f   :  { %v87_v51 = vsub.f32 %v85_v48, %v61_v40 }
 0x150   :  { %90 = vadd.xlane.f32.xlu1 %v88_v49 }
 0x151   :  { %v89_v52 = vmul.f32 %v87_v51, %v83_v50 }
 0x154   :  { %92 = vadd.xlane.f32.xlu1 %v89_v52 }
 0x1d1   :  { %v107_v54 = vpop.xlane.xlu1 %106 }
 0x1d2   :  { %v110_v56 = vsub.f32 0.0, %v107_v54 }
 0x1d5   :  { %v109_v55 = vpop.xlane.xlu0 %108 }
 0x1d6   :  { %v111_v57 = vsub.f32 0.0, %v109_v55 }
 0x1d8   :  { %v124_v58 = vadd.f32 %v111_v57, %v110_v56 }
 0x1d9   :  { %v91_v59 = vpop.xlane.xlu1 %90 }
 0x1da   :  { %v125_v60 = vrot.slane %v124_v58, 4 }
 0x1dc   :  { %v126_v61 = vadd.f32 %v125_v60, %v124_v58 }
 0x1dd   :  { %v93_v62 = vpop.xlane.xlu1 %92 }
 0x1de   :  { %v127_v63 = vrot.slane %v126_v61, 2  ;;  %v113_v0 = vadd.f32 %v93_v62, %v91_v59 }
 0x1e0   :  { %v128_v1 = vadd.f32 %v127_v63, %v126_v61  ;;  %v114_v2 = vrot.slane %v113_v0, 4 }
 0x1e2   :  { %v129_v3 = vrot.slane %v128_v1, 1  ;;  %v115_v4 = vadd.f32 %v114_v2, %v113_v0 }
 0x1e4   :  { %v130_v6 = vadd.f32 %v129_v3, %v128_v1  ;;  %v116_v7 = vrot.slane %v115_v4, 2 }
 0x1e6   :  { %v117_v8 = vadd.f32 %v116_v7, %v115_v4  ;;  %v131_v9 = vadd.f32 %v130_v6, %v123_v5 }
 0x1e8   :  { %v118_v10 = vrot.slane %v117_v8, 1  ;;  %132 = vst.msk [vmem:[#allocation3] sm:$0x1] %vm33_vm2, %v131_v9 }
 0x1ea   :  { %v119_v12 = vadd.f32 %v118_v10, %v117_v8 }
 0x1ec   :  { %v120_v13 = vadd.f32 %v119_v12, %v112_v11 }
 0x1ee   :  { %122 = vst.msk [vmem:[#allocation2] sm:$0x1] %vm33_vm2, %v120_v13 }
 0x1ef   :  { %v138_v14 = vld [vmem:[#allocation3] sm:$0x1] }
 0x1f0   :  { %v139_v17 = vmul.f32 0.003125, %v138_v14 }
 0x1f5   :  { %v136_v15 = vld [vmem:[#allocation2] sm:$0x1] }
 0x1f6   :  { %v137_v16 = vmul.f32 0.95, %v136_v15 }
 0x1f8   :  { %v140_v18 = vadd.f32 %v139_v17, %v137_v16 }
 0x1fa   :  { %141 = vst.msk [vmem:[#allocation7] sm:$0x1] %vm33_vm2, %v140_v18 }
 0x1fb   :  { %216 = shalt.err (!%p213_p9)
}
 0x1fc   :  { %151 = dma.vmem_to_hbm [thread:$0]  %s149_s25, 16, %s281_s3, [#allocation6]  }
 0x1fd   :  { %227 = dma.done.wait [#allocation6], 16  }
 0x1fe   :  { %228 = vsyncadd [#allocation6], 4294967280 }
 0x1ff   :  { %155 = vsyncpa [#allocation5], 1 }
 0x200   :  { %156 = vsyncpa [#allocation6], 1 }

</bundles_post_ra>
